<compile_context>
chip_gen: v7x
topology: tpu7x:2x2x1
jax: 0.10.0
libtpu: 0.0.40
codegen_flags: <defaults>
</compile_context>

<pallas_src>
import numpy as np
import jax
import jax.numpy as jnp
from jax.experimental import pallas as pl
from jax.experimental.pallas import tpu as pltpu

_LANE = 128      # vreg lane width (samples per block)
_SUBLANE = 8     # f32 sublane count
_MAX_TS = 2048   # max sample-blocks per grid step: 6 planes * 2 bufs * TS*512 B = 12 MiB VMEM


def _round_up(x: int, m: int) -> int:
    return ((x + m - 1) // m) * m


def _cdiv(a: int, b: int) -> int:
    return -(-a // b)


def _emit_linear_rows(planes, w_rows, out_ref):
    """out_ref[r] = sum_k w_rows[r][k] * planes[k], with compile-time weight folding."""
    for r, row in enumerate(w_rows):
        acc = None
        for w, p in zip(row, planes):
            if w == 0.0:
                continue                    # dead term: drop the FMA entirely
            if acc is None:
                acc = p if w == 1.0 else (-p if w == -1.0 else w * p)
            elif w == 1.0:
                acc = acc + p
            elif w == -1.0:
                acc = acc - p
            else:
                acc = acc + w * p
        if acc is None:                     # all-zero weight row
            acc = jnp.zeros_like(planes[0])
        out_ref[r] = acc


def _make_cond_kernel(w_np, lat_dim: int, n_cond: int, n_input: int):
    W = [[float(w_np[r, c]) for c in range(lat_dim + n_cond)] for r in range(n_input)]

    def kernel(zt_ref, ct_ref, ot_ref):
        # zt_ref: [lat_dim, TS, 128], ct_ref: [n_cond, TS, 128], ot_ref: [n_input, TS, 128]
        # Hoist plane loads out of the output-row loop: each input plane is read once.
        planes = [zt_ref[k] for k in range(lat_dim)] + [ct_ref[j] for j in range(n_cond)]
        _emit_linear_rows(planes, W, ot_ref)

    return kernel


def _make_uncond_kernel(w_np, lat_dim: int, n_input: int):
    W = [[float(w_np[r, c]) for c in range(lat_dim)] for r in range(n_input)]

    def kernel(zt_ref, ot_ref):
        planes = [zt_ref[k] for k in range(lat_dim)]
        _emit_linear_rows(planes, W, ot_ref)

    return kernel


class GeneratorPallas:
    """Linear generative model: x = W(z|v), W fixed integer weights (seed-deterministic)."""

    def __init__(self, lat_dim: int = 1, n_input: int = 2, n_cond: int = 3, seed: int = 100):
        assert lat_dim >= 1, "lat_dim must be >= 1"
        assert n_input >= 1, "n_input must be >= 1"
        assert n_cond >= 0, "n_cond must be >= 0"
        self.lat_dim = lat_dim
        self.n_input = n_input
        self.n_conditional = n_cond

        # Identical to `np.random.seed(seed); np.random.randint(...)` (same legacy
        # RandomState stream) without mutating global RNG state.
        rng = np.random.RandomState(seed)
        w = rng.randint(-8, 8, size=(n_input, lat_dim + n_cond))
        self._w_np = np.asarray(w, dtype=np.float32)
        self.W = jnp.asarray(self._w_np)  # exposed for reference checks

        if n_cond > 0:
            self._kernel = _make_cond_kernel(self._w_np, lat_dim, n_cond, n_input)
            self._forward = jax.jit(self._forward_cond)
        else:
            self._kernel = _make_uncond_kernel(self._w_np, lat_dim, n_input)
            self._forward = jax.jit(self._forward_uncond)

    # ---- tiling plan (all static under jit) ---------------------------------

    def _plan(self, n: int):
        """Return (nb, ts, n_steps): nb sample-blocks of 128, ts blocks per grid step."""
        nb_min = _cdiv(n, _LANE)
        if nb_min <= _SUBLANE:
            # Tiny problem: single step, block's second-minor dim == full array dim.
            return nb_min, nb_min, 1
        nb8 = _round_up(nb_min, _SUBLANE)          # pad only to the 8x128=1024 granule
        n_steps = _cdiv(nb8, _MAX_TS)
        if nb8 >= 2 * _SUBLANE:
            n_steps = max(n_steps, 2)              # >=2 steps so both v7x TCs get work
        if n_steps > 1 and n_steps % 2:
            n_steps += 1                           # even step count splits cleanly over 2 TCs
        ts = _round_up(_cdiv(nb8, n_steps), _SUBLANE)
        return n_steps * ts, ts, n_steps

    def _pack(self, x, n_feat: int, n: int, n_pad: int, nb: int):
        """Sample-major [n, n_feat] -> feature-major planes [n_feat, nb, 128]."""
        if n_pad != n:
            x = jnp.pad(x, ((0, n_pad - n), (0, 0)))
        if n_feat == 1:
            return x.reshape(1, nb, _LANE)         # free reshape: no HBM pass
        return x.T.reshape(n_feat, nb, _LANE)      # one XLA transpose (feature-major pack)

    # ---- traced forward paths ----------------------------------------------

    def _forward_cond(self, z, cond):
        n = z.shape[0]
        nb, ts, n_steps = self._plan(n)
        n_pad = nb * _LANE

        zt = self._pack(z, self.lat_dim, n, n_pad, nb)
        ct = self._pack(cond, self.n_conditional, n, n_pad, nb)

        ot = pl.pallas_call(
            self._kernel,
            out_shape=jax.ShapeDtypeStruct((self.n_input, nb, _LANE), jnp.float32),
            grid=(n_steps,),
            in_specs=[
                pl.BlockSpec((self.lat_dim, ts, _LANE), lambda i: (0, i, 0)),
                pl.BlockSpec((self.n_conditional, ts, _LANE), lambda i: (0, i, 0)),
            ],
            out_specs=pl.BlockSpec((self.n_input, ts, _LANE), lambda i: (0, i, 0)),
            compiler_params=pltpu.CompilerParams(
                dimension_semantics=("parallel",),
            ),
        )(zt, ct)

        # feature-major [n_input, n_pad] -> sample-major [n, n_input]
        return ot.reshape(self.n_input, n_pad)[:, :n].T

    def _forward_uncond(self, z):
        n = z.shape[0]
        nb, ts, n_steps = self._plan(n)
        n_pad = nb * _LANE

        zt = self._pack(z, self.lat_dim, n, n_pad, nb)

        ot = pl.pallas_call(
            self._kernel,
            out_shape=jax.ShapeDtypeStruct((self.n_input, nb, _LANE), jnp.float32),
            grid=(n_steps,),
            in_specs=[pl.BlockSpec((self.lat_dim, ts, _LANE), lambda i: (0, i, 0))],
            out_specs=pl.BlockSpec((self.n_input, ts, _LANE), lambda i: (0, i, 0)),
            compiler_params=pltpu.CompilerParams(
                dimension_semantics=("parallel",),
            ),
        )(zt)

        return ot.reshape(self.n_input, n_pad)[:, :n].T

    # ---- public API ----------------------------------------------------------

    def __call__(self, z, cond_data=None):
        z = jnp.asarray(z, dtype=jnp.float32)
        assert z.ndim == 2 and z.shape[1] == self.lat_dim
        if self.n_conditional > 0:
            assert cond_data is not None, "conditional model requires cond_data"
            cond_data = jnp.asarray(cond_data, dtype=jnp.float32)
            assert cond_data.ndim == 2 and cond_data.shape[1] == self.n_conditional
            assert cond_data.shape[0] == z.shape[0], "z / cond_data sample counts differ"
            return self._forward(z, cond_data)
        return self._forward(z)


if __name__ == "__main__":
    lat_dim, n_input, n_cond = 1, 2, 3
    gen = GeneratorPallas(lat_dim=lat_dim, n_input=n_input, n_cond=n_cond, seed=100)

    key = jax.random.PRNGKey(0)
    kz, kc = jax.random.split(key)

    # Cases: tiny (single 128-block), non-multiple-of-128 padding path,
    # and a multi-grid-step (2-way parallel) path.
    for num_samples in (8, 300, 2500):
        z = jax.random.normal(kz, (num_samples, lat_dim), dtype=jnp.float32)
        cond = jax.random.normal(kc, (num_samples, n_cond), dtype=jnp.float32)

        obs = jax.block_until_ready(gen(z, cond))

        # Reference: obs_ref = [z | cond] @ W^T
        obs_ref = jnp.concatenate([z, cond], axis=1) @ gen.W.T
        np.testing.assert_allclose(np.asarray(obs), np.asarray(obs_ref),
                                   rtol=1e-5, atol=1e-5)

    print("KERNEL_OK")
</pallas_src>

<mosaic_0001>
module attributes {stable_mosaic.version = 11 : i64} {
  func.func @kernel(%arg0: i32, %arg1: memref<1x1x128xf32, #tpu.memory_space<vmem>>, %arg2: memref<3x1x128xf32, #tpu.memory_space<vmem>>, %arg3: memref<2x1x128xf32, #tpu.memory_space<vmem>>) attributes {dimension_semantics = [#tpu.dimension_semantics<parallel>], iteration_bounds = array<i64: 1>, scalar_prefetch = 0 : i64, scratch_operands = 0 : i64, tpu.core_type = #tpu.core_type<tc>, window_params = [{transform_indices = @transform_0, window_bounds = array<i64: 1, 1, 128>}, {transform_indices = @transform_1, window_bounds = array<i64: 3, 1, 128>}, {transform_indices = @transform_2, window_bounds = array<i64: 2, 1, 128>}]} {
    %c0 = arith.constant 0 : index
    %c0_0 = arith.constant 0 : index
    %c0_1 = arith.constant 0 : index
    %0 = vector.load %arg1[%c0, %c0_0, %c0_1] : memref<1x1x128xf32, #tpu.memory_space<vmem>>, vector<1x1x128xf32>
    %1 = vector.shape_cast %0 : vector<1x1x128xf32> to vector<1x128xf32>
    %c0_2 = arith.constant 0 : index
    %c0_3 = arith.constant 0 : index
    %c0_4 = arith.constant 0 : index
    %2 = vector.load %arg2[%c0_2, %c0_3, %c0_4] : memref<3x1x128xf32, #tpu.memory_space<vmem>>, vector<1x1x128xf32>
    %3 = vector.shape_cast %2 : vector<1x1x128xf32> to vector<1x128xf32>
    %c1 = arith.constant 1 : index
    %c0_5 = arith.constant 0 : index
    %c0_6 = arith.constant 0 : index
    %4 = vector.load %arg2[%c1, %c0_5, %c0_6] : memref<3x1x128xf32, #tpu.memory_space<vmem>>, vector<1x1x128xf32>
    %5 = vector.shape_cast %4 : vector<1x1x128xf32> to vector<1x128xf32>
    %c2 = arith.constant 2 : index
    %c0_7 = arith.constant 0 : index
    %c0_8 = arith.constant 0 : index
    %6 = vector.load %arg2[%c2, %c0_7, %c0_8] : memref<3x1x128xf32, #tpu.memory_space<vmem>>, vector<1x1x128xf32>
    %7 = vector.shape_cast %6 : vector<1x1x128xf32> to vector<1x128xf32>
    %cst = arith.constant -5.000000e+00 : f32
    %8 = vector.broadcast %cst : f32 to vector<1x128xf32>
    %9 = arith.mulf %8, %5 : vector<1x128xf32>
    %10 = arith.subf %9, %7 : vector<1x128xf32>
    %c0_9 = arith.constant 0 : index
    %c0_10 = arith.constant 0 : index
    %c0_11 = arith.constant 0 : index
    %11 = vector.load %arg3[%c0_9, %c0_10, %c0_11] : memref<2x1x128xf32, #tpu.memory_space<vmem>>, vector<1x1x128xf32>
    %12 = vector.shape_cast %11 : vector<1x1x128xf32> to vector<1x128xf32>
    %13 = vector.shape_cast %10 : vector<1x128xf32> to vector<1x1x128xf32>
    tpu.vector_store %arg3[%c0_9, %c0_10, %c0_11], %13 {strides = array<i32>} : memref<2x1x128xf32, #tpu.memory_space<vmem>>, vector<1x1x128xf32>,
    %cst_12 = arith.constant 0.000000e+00 : f32
    %14 = vector.broadcast %cst_12 : f32 to vector<1x128xf32>
    %15 = arith.subf %14, %1 : vector<1x128xf32>
    %cst_13 = arith.constant 7.000000e+00 : f32
    %16 = vector.broadcast %cst_13 : f32 to vector<1x128xf32>
    %17 = arith.mulf %16, %3 : vector<1x128xf32>
    %18 = arith.addf %15, %17 : vector<1x128xf32>
    %cst_14 = arith.constant -8.000000e+00 : f32
    %19 = vector.broadcast %cst_14 : f32 to vector<1x128xf32>
    %20 = arith.mulf %19, %5 : vector<1x128xf32>
    %21 = arith.addf %18, %20 : vector<1x128xf32>
    %cst_15 = arith.constant 2.000000e+00 : f32
    %22 = vector.broadcast %cst_15 : f32 to vector<1x128xf32>
    %23 = arith.mulf %22, %7 : vector<1x128xf32>
    %24 = arith.addf %21, %23 : vector<1x128xf32>
    %c1_16 = arith.constant 1 : index
    %c0_17 = arith.constant 0 : index
    %c0_18 = arith.constant 0 : index
    %25 = vector.load %arg3[%c1_16, %c0_17, %c0_18] : memref<2x1x128xf32, #tpu.memory_space<vmem>>, vector<1x1x128xf32>
    %26 = vector.shape_cast %25 : vector<1x1x128xf32> to vector<1x128xf32>
    %27 = vector.shape_cast %24 : vector<1x128xf32> to vector<1x1x128xf32>
    tpu.vector_store %arg3[%c1_16, %c0_17, %c0_18], %27 {strides = array<i32>} : memref<2x1x128xf32, #tpu.memory_space<vmem>>, vector<1x1x128xf32>,
    return
  }
  func.func @transform_0(%arg0: i32) -> (i32, i32, i32) {
    %c0_i32 = arith.constant 0 : i32
    %c0_i32_0 = arith.constant 0 : i32
    %c0_i32_1 = arith.constant 0 : i32
    return %c0_i32, %arg0, %c0_i32_0 : i32, i32, i32
  }
  func.func @transform_1(%arg0: i32) -> (i32, i32, i32) {
    %c0_i32 = arith.constant 0 : i32
    %c0_i32_0 = arith.constant 0 : i32
    %c0_i32_1 = arith.constant 0 : i32
    return %c0_i32, %arg0, %c0_i32_0 : i32, i32, i32
  }
  func.func @transform_2(%arg0: i32) -> (i32, i32, i32) {
    %c0_i32 = arith.constant 0 : i32
    %c0_i32_0 = arith.constant 0 : i32
    %c0_i32_1 = arith.constant 0 : i32
    return %c0_i32, %arg0, %c0_i32_0 : i32, i32, i32
  }
}

</mosaic_0001>

<bundles_post_ra>
// kernel: _forward_cond.1
= control target key start
LH: loop header
LB: loop body
LE: loop exit
PB: predicated region body
PF: predicated region fallthrough
CT: control target
= control target key end

     0   :  { %s69_s1 = inlined_call_operand.vmem [shape: f32[3,1,128], index: 1, kind: input, shape index: {}]   ;;  %s70_s0 = inlined_call_operand.vmem [shape: f32[1,1,128], index: 0, kind: input, shape index: {}]   ;;  %s71_s2 = inlined_call_operand.vmem [shape: f32[2,1,128], index: 2, kind: output, shape index: {}]  }
   0x1   :  { %v12_v0 = vld [vmem:[%s69_s1] sm:$0x1]  ;;  %v33_v1 = vld [vmem:[%s69_s1 + $0x1] sm:$0x1]  ;;  %v34_v2 = vld [vmem:[%s69_s1 + $0x2] sm:$0x1] }
   0x2   :  { %v17_v3 = vmul.f32 -5.0, %v33_v1  ;;  %v21_v4 = vmul.f32 7.0, %v12_v0  ;;  %v11_v5 = vld [vmem:[%s70_s0] sm:$0x1]  ;;  %v23_v7 = vmul.f32 -8.0, %v33_v1  ;;  %v25_v10 = vmul.f32 2.0, %v34_v2 }
   0x3   :  { %v20_v6 = vsub.f32 0.0, %v11_v5 }
   0x4   :  { %v18_v8 = vsub.f32 %v17_v3, %v34_v2 }
   0x5   :  { %v22_v9 = vadd.f32 %v21_v4, %v20_v6 }
   0x6   :  { %19 = vst [vmem:[%s71_s2] sm:$0x1] %v18_v8 }
   0x7   :  { %v24_v11 = vadd.f32 %v23_v7, %v22_v9 }
   0x9   :  { %v26_v12 = vadd.f32 %v25_v10, %v24_v11 }
   0xb   :  { %35 = vst [vmem:[%s71_s2 + $0x1] sm:$0x1] %v26_v12 }

</bundles_post_ra>
